<compile_context>
chip_gen: v5e
topology: v5e:2x2
jax: 0.10.0
libtpu: 0.0.40
codegen_flags: <defaults>
</compile_context>

<pallas_src>
import functools

import jax
import jax.numpy as jnp
from jax.experimental import pallas as pl
from jax.experimental.pallas import tpu as pltpu

FEATURE_DIM = 768        # convnext_tiny feature width after global avg-pool
LANE = 128
NEG_INF = -1e30          # keep in f32: exp underflows to exactly 0
TILE_B_MAX = 512         # <=512 rows/tile => >=2 grid steps for B >= 1024


def _round_up(x, m):
    return ((x + m - 1) // m) * m


def _pick_tile_b(batch):
    """Pick a batch tile (multiple of 8, <=512) targeting >=2 grid steps."""
    half = _round_up(max(1, -(-batch // 2)), 8)
    return max(8, min(TILE_B_MAX, half))


def convnext_gp_head_kernel(feat_ref, w_ref, b_ref, o_ref):
    """out = log_softmax(feat @ W + b, axis=-1) for one batch tile."""
    # f32 features arrive straight from HBM; cast to bf16 on the VPU so the
    # MXU runs bf16 x bf16 with f32 accumulation.
    feat = feat_ref[...].astype(jnp.bfloat16)
    logits = jnp.dot(feat, w_ref[...], preferred_element_type=jnp.float32)
    logits = logits + b_ref[...]                 # padded class columns = -1e30
    m = jnp.max(logits, axis=-1, keepdims=True)
    z = logits - m
    lse = jnp.log(jnp.sum(jnp.exp(z), axis=-1, keepdims=True))
    o_ref[...] = z - lse


def prepare_head_params(w_cls, b_cls):
    """One-time (model setup) padding + bf16 cast of the classifier params.

    w_cls: [768, num_classes] (already transposed from PyTorch's [out, in]).
    b_cls: [num_classes].
    Returns (w_p bf16 [768, n_pad], b_p f32 [1, n_pad]) with n_pad a multiple
    of 128; padded columns carry a -1e30 bias so they vanish in the softmax.
    """
    num_classes = w_cls.shape[1]
    n_pad = _round_up(max(num_classes, LANE), LANE)
    w_p = jnp.zeros((FEATURE_DIM, n_pad), jnp.bfloat16)
    w_p = w_p.at[:, :num_classes].set(w_cls.astype(jnp.bfloat16))
    b_p = jnp.full((1, n_pad), NEG_INF, jnp.float32)
    b_p = b_p.at[0, :num_classes].set(b_cls.astype(jnp.float32))
    return w_p, b_p


@functools.partial(jax.jit, static_argnames=("num_classes",))
def convnext_gp_forward(features, w_p, b_p, *, num_classes):
    """features: [B, 768, 1, 1] (or [B, 768]) float32 — output of the frozen
    pretrained ConvNeXt-Tiny backbone (classifier = Identity).
    w_p, b_p: padded classifier params from prepare_head_params().
    Returns log-probabilities [B, num_classes] float32."""
    B = features.shape[0]
    feat2d = features.reshape(B, FEATURE_DIM)    # nn.Flatten(start_dim=1)
    n_pad = w_p.shape[1]

    tile_b = _pick_tile_b(B)
    grid = (pl.cdiv(B, tile_b),)                 # ragged last block handled by
                                                 # Pallas (edge-masked stores)
    out = pl.pallas_call(
        convnext_gp_head_kernel,
        out_shape=jax.ShapeDtypeStruct((B, n_pad), jnp.float32),
        grid=grid,
        in_specs=[
            pl.BlockSpec((tile_b, FEATURE_DIM), lambda i: (i, 0)),   # features
            pl.BlockSpec((FEATURE_DIM, n_pad), lambda i: (0, 0)),    # W (resident)
            pl.BlockSpec((1, n_pad), lambda i: (0, 0)),              # b (resident)
        ],
        out_specs=pl.BlockSpec((tile_b, n_pad), lambda i: (i, 0)),
        compiler_params=pltpu.CompilerParams(
            dimension_semantics=("parallel",)),
    )(feat2d, w_p, b_p)

    # Only the lane-padding columns need dropping; the batch dim is exact.
    return out[:, :num_classes]


if __name__ == "__main__":
    key = jax.random.PRNGKey(0)
    k_feat, k_w, k_b = jax.random.split(key, 3)

    B, num_classes = 2, 10
    # What the frozen ConvNeXt-Tiny returns with classifier = nn.Identity().
    features = jax.random.normal(k_feat, (B, FEATURE_DIM, 1, 1), jnp.float32)

    bound = 1.0 / (FEATURE_DIM ** 0.5)  # nn.Linear default init
    w_cls = jax.random.uniform(k_w, (FEATURE_DIM, num_classes), jnp.float32,
                               -bound, bound)
    b_cls = jax.random.uniform(k_b, (num_classes,), jnp.float32, -bound, bound)

    # Model-setup-time param preparation (hoisted out of the per-call forward).
    w_p, b_p = prepare_head_params(w_cls, b_cls)

    out = convnext_gp_forward(features, w_p, b_p, num_classes=num_classes)
    out = jax.block_until_ready(out)
    assert out.shape == (B, num_classes), out.shape

    # Reference with the same bf16 casts (apples-to-apples with MXU math).
    feat_bf = features.reshape(B, -1).astype(jnp.bfloat16)
    logits_ref = jnp.dot(feat_bf, w_cls.astype(jnp.bfloat16),
                         preferred_element_type=jnp.float32) + b_cls
    ref = jax.nn.log_softmax(logits_ref, axis=-1)
    assert jnp.allclose(out, ref, atol=2e-3, rtol=2e-3), "mismatch vs reference"
    # Rows must be valid log-probabilities.
    assert jnp.allclose(jnp.exp(out).sum(-1), 1.0, atol=1e-3)

    print("KERNEL_OK")
</pallas_src>

<mosaic_0001>
module attributes {stable_mosaic.version = 11 : i64} {
  func.func @convnext_gp_head_kernel(%arg0: i32, %arg1: memref<8x768xf32, #tpu.memory_space<vmem>>, %arg2: memref<768x128xbf16, #tpu.memory_space<vmem>>, %arg3: memref<1x128xf32, #tpu.memory_space<vmem>>, %arg4: memref<8x128xf32, #tpu.memory_space<vmem>>) attributes {dimension_semantics = [#tpu.dimension_semantics<parallel>], iteration_bounds = array<i64: 1>, scalar_prefetch = 0 : i64, scratch_operands = 0 : i64, tpu.core_type = #tpu.core_type<tc>, window_params = [{transform_indices = @transform_0, window_bounds = array<i64: 8, 768>}, {pipeline_mode = #tpu.pipeline_mode<synchronous>, transform_indices = @transform_1, window_bounds = array<i64: 768, 128>}, {pipeline_mode = #tpu.pipeline_mode<synchronous>, transform_indices = @transform_2, window_bounds = array<i64: 1, 128>}, {transform_indices = @transform_3, window_bounds = array<i64: 8, 128>}]} {
    %c0 = arith.constant 0 : index
    %c0_0 = arith.constant 0 : index
    %0 = vector.load %arg1[%c0, %c0_0] : memref<8x768xf32, #tpu.memory_space<vmem>>, vector<8x768xf32>
    %1 = arith.truncf %0 : vector<8x768xf32> to vector<8x768xbf16>
    %c0_1 = arith.constant 0 : index
    %c0_2 = arith.constant 0 : index
    %2 = vector.load %arg2[%c0_1, %c0_2] : memref<768x128xbf16, #tpu.memory_space<vmem>>, vector<768x128xbf16>
    %cst = arith.constant dense<0.000000e+00> : vector<8x128xf32>
    %3 = tpu.matmul %1, %2, %cst {dimension_numbers = #tpu.dot_dimension_numbers<[1], [0], [0], [1], [0, 0, 1, 1], [], []>} : vector<8x768xbf16>, vector<768x128xbf16>, vector<8x128xf32> -> vector<8x128xf32>
    %c0_3 = arith.constant 0 : index
    %c0_4 = arith.constant 0 : index
    %4 = vector.load %arg3[%c0_3, %c0_4] : memref<1x128xf32, #tpu.memory_space<vmem>>, vector<1x128xf32>
    %5 = vector.broadcast %4 : vector<1x128xf32> to vector<8x128xf32>
    %6 = arith.addf %3, %5 : vector<8x128xf32>
    %cst_5 = arith.constant dense<0xFF800000> : vector<8xf32>
    %7 = vector.multi_reduction <maximumf>, %6, %cst_5 [1] : vector<8x128xf32> to vector<8xf32>
    %8 = vector.shape_cast %7 : vector<8xf32> to vector<8x1xf32>
    %9 = vector.broadcast %8 : vector<8x1xf32> to vector<8x128xf32>
    %10 = arith.subf %6, %9 : vector<8x128xf32>
    %11 = math.exp %10 : vector<8x128xf32>
    %cst_6 = arith.constant dense<0.000000e+00> : vector<8xf32>
    %12 = vector.multi_reduction <add>, %11, %cst_6 [1] : vector<8x128xf32> to vector<8xf32>
    %13 = vector.shape_cast %12 : vector<8xf32> to vector<8x1xf32>
    %14 = math.log %13 : vector<8x1xf32>
    %15 = vector.broadcast %14 : vector<8x1xf32> to vector<8x128xf32>
    %16 = arith.subf %10, %15 : vector<8x128xf32>
    %c0_7 = arith.constant 0 : index
    %c0_8 = arith.constant 0 : index
    %17 = vector.load %arg4[%c0_7, %c0_8] : memref<8x128xf32, #tpu.memory_space<vmem>>, vector<8x128xf32>
    tpu.vector_store %arg4[%c0_7, %c0_8], %16 {strides = array<i32>} : memref<8x128xf32, #tpu.memory_space<vmem>>, vector<8x128xf32>,
    return
  }
  func.func @transform_0(%arg0: i32) -> (i32, i32) {
    %c0_i32 = arith.constant 0 : i32
    %c0_i32_0 = arith.constant 0 : i32
    return %arg0, %c0_i32 : i32, i32
  }
  func.func @transform_1(%arg0: i32) -> (i32, i32) {
    %c0_i32 = arith.constant 0 : i32
    %c0_i32_0 = arith.constant 0 : i32
    %c0_i32_1 = arith.constant 0 : i32
    return %c0_i32, %c0_i32_0 : i32, i32
  }
  func.func @transform_2(%arg0: i32) -> (i32, i32) {
    %c0_i32 = arith.constant 0 : i32
    %c0_i32_0 = arith.constant 0 : i32
    %c0_i32_1 = arith.constant 0 : i32
    return %c0_i32, %c0_i32_0 : i32, i32
  }
  func.func @transform_3(%arg0: i32) -> (i32, i32) {
    %c0_i32 = arith.constant 0 : i32
    %c0_i32_0 = arith.constant 0 : i32
    return %arg0, %c0_i32 : i32, i32
  }
}

</mosaic_0001>

<bundles_post_ra>
// kernel: convnext_gp_forward.1
= control target key start
LH: loop header
LB: loop body
LE: loop exit
PB: predicated region body
PF: predicated region fallthrough
CT: control target
= control target key end

     0   :  { %8 = vsyncpa [#allocation3], 0  ;;  %s938_s0 = inlined_call_operand.vmem [shape: f32[2,768], index: 0, kind: input, shape index: {}]   ;;  %s939_s1 = inlined_call_operand.hbm [shape: bf16[768,128], index: 1, kind: input, shape index: {}]   ;;  %s940_s2 = inlined_call_operand.vmem [shape: f32[1,128], index: 2, kind: input, shape index: {}]   ;;  %s941_s3 = inlined_call_operand.hbm [shape: f32[2,128], index: 3, kind: output, shape index: {}]  }
   0x1   :  { %9 = vsyncpa [#allocation4], 0  ;;  %s16_s14 = sshll.u32 %s939_s1, 4  ;;  %s879_s15 = smov [#allocation2]   ;;  %s17_s14 = int_to_ptr.hbm [resolvable:$true] %s16_s14 }
   0x2   :  { %s18_s16 = sshll.u32 %s879_s15, 4  ;;  %s880_s17 = smov 64   ;;  %s19_s16 = int_to_ptr.vmem [resolvable:$true] %s18_s16 }
   0x3   :  { %s881_s18 = smov 4  }
   0x4   :  { %24 = dma.hbm_to_vmem [thread:$0]  %s17_s14, 6144, %s19_s16, [#allocation3], %s880_s17, %s880_s17, %s881_s18  }
   0x5   :  { %875 = dma.done.wait [#allocation3], 6144  }
   0x6   :  { %876 = vsyncadd [#allocation3], 4294961152  ;;  %v775_v0 = vld [vmem:[#allocation2 + $0x38] sm:$0xff]  ;;  %v774_v2 = vld [vmem:[#allocation2 + $0x30] sm:$0xff] }
   0x7   :  { %v783_v1 = vld [vmem:[#allocation2 + $0x78] sm:$0xff]  ;;  %468 = vmatpush.bf16.msra.mxu0 %v775_v0  ;;  %v782_v3 = vld [vmem:[#allocation2 + $0x70] sm:$0xff]  ;;  %v773_v8 = vld [vmem:[#allocation2 + $0x28] sm:$0xff] }
   0x8   :  { %481 = vmatpush.bf16.msra.mxu1 %v783_v1  ;;  %v791_v4 = vld [vmem:[#allocation2 + $0xb8] sm:$0xff]  ;;  %v790_v6 = vld [vmem:[#allocation2 + $0xb0] sm:$0xff]  ;;  %v781_v9 = vld [vmem:[#allocation2 + $0x68] sm:$0xff] }
   0x9   :  { %v799_v5 = vld [vmem:[#allocation2 + $0xf8] sm:$0xff]  ;;  %494 = vmatpush.bf16.msra.mxu2 %v791_v4  ;;  %v798_v7 = vld [vmem:[#allocation2 + $0xf0] sm:$0xff]  ;;  %v789_v10 = vld [vmem:[#allocation2 + $0xa8] sm:$0xff] }
   0xa   :  { %507 = vmatpush.bf16.msra.mxu3 %v799_v5  ;;  %v797_v11 = vld [vmem:[#allocation2 + $0xe8] sm:$0xff]  ;;  %v772_v12 = vld [vmem:[#allocation2 + $0x20] sm:$0xff]  ;;  %v31_v14 = vld [vmem:[%s938_s0] sm:$0xff] }
   0xb   :  { %469 = vmatpush.bf16.msra.mxu0 %v774_v2  ;;  %v780_v13 = vld [vmem:[#allocation2 + $0x60] sm:$0xff]  ;;  %v35_v16 = vld [vmem:[%s938_s0 + $0x18] sm:$0xff]  ;;  %47 = vst [vmem:[#allocation1] ss:$4 sm:$0xff] %v31_v14  ;;  %v771_v20 = vld [vmem:[#allocation2 + $0x18] sm:$0xff] }
   0xc   :  { %482 = vmatpush.bf16.msra.mxu1 %v782_v3  ;;  %v33_v15 = vld [vmem:[%s938_s0 + $0xc] sm:$0xff]  ;;  %v37_v18 = vld [vmem:[%s938_s0 + $0x24] sm:$0xff]  ;;  %51 = vst [vmem:[#allocation1 + $0x2] ss:$4 sm:$0xff] %v35_v16  ;;  %v770_v24 = vld [vmem:[#allocation2 + $0x10] sm:$0xff] }
   0xd   :  { %495 = vmatpush.bf16.msra.mxu2 %v790_v6  ;;  %v788_v17 = vld [vmem:[#allocation2 + $0xa0] sm:$0xff]  ;;  %49 = vst [vmem:[#allocation1 + $0x1] ss:$4 sm:$0xff] %v33_v15  ;;  %v779_v21 = vld [vmem:[#allocation2 + $0x58] sm:$0xff]  ;;  %v778_v25 = vld [vmem:[#allocation2 + $0x50] sm:$0xff] }
   0xe   :  { %508 = vmatpush.bf16.msra.mxu3 %v798_v7  ;;  %v796_v19 = vld [vmem:[#allocation2 + $0xe0] sm:$0xff]  ;;  %53 = vst [vmem:[#allocation1 + $0x3] ss:$4 sm:$0xff] %v37_v18  ;;  %v787_v22 = vld [vmem:[#allocation2 + $0x98] sm:$0xff]  ;;  %v34_v27 = vld [vmem:[%s938_s0 + $0x14] sm:$0xf] }
   0xf   :  { %470 = vmatpush.bf16.msra.mxu0 %v773_v8  ;;  %v795_v23 = vld [vmem:[#allocation2 + $0xd8] sm:$0xff]  ;;  %v32_v26 = vld [vmem:[%s938_s0 + $0x8] sm:$0xf]  ;;  %v786_v28 = vld [vmem:[#allocation2 + $0x90] sm:$0xff]  ;;  %57 = vst [vmem:[#allocation1 + $0x21] ss:$4 sm:$0xff] %v34_v27 }
  0x10   :  { %483 = vmatpush.bf16.msra.mxu1 %v781_v9  ;;  %55 = vst [vmem:[#allocation1 + $0x20] ss:$4 sm:$0xff] %v32_v26  ;;  %v794_v29 = vld [vmem:[#allocation2 + $0xd0] sm:$0xff]  ;;  %v36_v30 = vld [vmem:[%s938_s0 + $0x20] sm:$0xf]  ;;  %v769_v31 = vld [vmem:[#allocation2 + $0x8] sm:$0xff] }
  0x11   :  { %496 = vmatpush.bf16.msra.mxu2 %v789_v10  ;;  %v777_v32 = vld [vmem:[#allocation2 + $0x48] sm:$0xff]  ;;  %v38_v33 = vld [vmem:[%s938_s0 + $0x2c] sm:$0xf]  ;;  %59 = vst [vmem:[#allocation1 + $0x22] ss:$4 sm:$0xff] %v36_v30  ;;  %v807_v40 = vld [vmem:[#allocation2 + $0x138] sm:$0xff] }
  0x12   :  { %509 = vmatpush.bf16.msra.mxu3 %v797_v11  ;;  %v785_v34 = vld [vmem:[#allocation2 + $0x88] sm:$0xff]  ;;  %v768_v35 = vld [vmem:[#allocation2] sm:$0xff]  ;;  %61 = vst [vmem:[#allocation1 + $0x23] ss:$4 sm:$0xff] %v38_v33  ;;  %v815_v41 = vld [vmem:[#allocation2 + $0x178] sm:$0xff] }
  0x13   :  { %471 = vmatpush.bf16.msra.mxu0 %v772_v12  ;;  %v776_v36 = vld [vmem:[#allocation2 + $0x40] sm:$0xff]  ;;  %v793_v37 = vld [vmem:[#allocation2 + $0xc8] sm:$0xff]  ;;  %v806_v48 = vld [vmem:[#allocation2 + $0x130] sm:$0xff] }
  0x14   :  { %484 = vmatpush.bf16.msra.mxu1 %v780_v13  ;;  %v784_v42 = vld [vmem:[#allocation2 + $0x80] sm:$0xff]  ;;  %v814_v49 = vld [vmem:[#allocation2 + $0x170] sm:$0xff]  ;;  %v805_v52 = vld [vmem:[#allocation2 + $0x128] sm:$0xff] }
  0x15   :  { %497 = vmatpush.bf16.msra.mxu2 %v788_v17  ;;  %v62_v38 = vld.sshfl [vmem:[#allocation1] sm:$0xff pattern:$0x73625140]  ;;  %v63_v39 = vld.sshfl [vmem:[#allocation1 + $0x8] sm:$0xff pattern:$0x73625140] }
  0x16   :  { %510 = vmatpush.bf16.msra.mxu3 %v796_v19  ;;  %v74_v43 = vpack.c.bf16 %v62_v38, %v62_v38  ;;  %v75_v44 = vpack.c.bf16 %v63_v39, %v63_v39  ;;  %v64_v45 = vld.sshfl [vmem:[#allocation1 + $0x10] sm:$0xff pattern:$0x73625140]  ;;  %v792_v46 = vld [vmem:[#allocation2 + $0xc0] sm:$0xff]  ;;  %v803_v56 = vld [vmem:[#allocation2 + $0x118] sm:$0xff] }
  0x17   :  { %472 = vmatpush.bf16.msra.mxu0 %v771_v20  ;;  %v65_v47 = vld.sshfl [vmem:[#allocation1 + $0x18] sm:$0xff pattern:$0x73625140]  ;;  %v76_v50 = vpack.c.bf16 %v64_v45, %v64_v45  ;;  %v813_v53 = vld [vmem:[#allocation2 + $0x168] sm:$0xff]  ;;  %v804_v54 = vld [vmem:[#allocation2 + $0x120] sm:$0xff] }
  0x18   :  { %485 = vmatpush.bf16.msra.mxu1 %v779_v21  ;;  %v77_v51 = vpack.c.bf16 %v65_v47, %v65_v47  ;;  %v812_v55 = vld [vmem:[#allocation2 + $0x160] sm:$0xff]  ;;  %v811_v57 = vld [vmem:[#allocation2 + $0x158] sm:$0xff]  ;;  %v802_v58 = vld [vmem:[#allocation2 + $0x110] sm:$0xff] }
  0x19   :  { %498 = vmatpush.bf16.msra.mxu2 %v787_v22  ;;  %v810_v59 = vld [vmem:[#allocation2 + $0x150] sm:$0xff]  ;;  %v801_v60 = vld [vmem:[#allocation2 + $0x108] sm:$0xff]  ;;  %v800_v62 = vld [vmem:[#allocation2 + $0x100] sm:$0xff] }
  0x1a   :  { %511 = vmatpush.bf16.msra.mxu3 %v795_v23  ;;  %v809_v61 = vld [vmem:[#allocation2 + $0x148] sm:$0xff]  ;;  %v808_v63 = vld [vmem:[#allocation2 + $0x140] sm:$0xff]  ;;  %v66_v0 = vld.sshfl [vmem:[#allocation1 + $0x20] sm:$0xff pattern:$0x73625140] }
  0x1b   :  { %473 = vmatpush.bf16.msra.mxu0 %v770_v24  ;;  %v67_v1 = vld.sshfl [vmem:[#allocation1 + $0x28] sm:$0xff pattern:$0x73625140]  ;;  %v78_v2 = vpack.c.bf16 %v66_v0, %v66_v0  ;;  %v822_v10 = vld [vmem:[%s940_s2] ss:$0 sm:$0xff] }
  0x1c   :  { %486 = vmatpush.bf16.msra.mxu1 %v778_v25  ;;  %v79_v3 = vpack.c.bf16 %v67_v1, %v67_v1 }
  0x1d   :  { %499 = vmatpush.bf16.msra.mxu2 %v786_v28 }
  0x1e   :  { %512 = vmatpush.bf16.msra.mxu3 %v794_v29 }
  0x1f   :  { %474 = vmatpush.bf16.msra.mxu0 %v769_v31 }
  0x20   :  { %487 = vmatpush.bf16.msra.mxu1 %v777_v32 }
  0x21   :  { %500 = vmatpush.bf16.msra.mxu2 %v785_v34 }
  0x22   :  { %513 = vmatpush.bf16.msra.mxu3 %v793_v37 }
  0x23   :  { %475 = vmatpush.bf16.msra.mxu0 %v768_v35 }
  0x24   :  { %488 = vmatpush.bf16.msra.mxu1 %v776_v36 }
  0x25   :  { %501 = vmatpush.bf16.msra.mxu2 %v784_v42 }
  0x26   :  { %476 = vmatmul.bf16.vlgmr.msra.gmra.mxu0 %v74_v43  ;;  %514 = vmatpush.bf16.msra.mxu3 %v792_v46 }
  0x27   :  { %520 = vmatpush.bf16.msrb.mxu0 %v807_v40  ;;  %489 = vmatmul.bf16.vlgmr.msra.gmra.mxu1 %v75_v44 }
  0x28   :  { %533 = vmatpush.bf16.msrb.mxu1 %v815_v41  ;;  %502 = vmatmul.bf16.vlgmr.msra.gmra.mxu2 %v76_v50 }
  0x29   :  { %515 = vmatmul.bf16.vlgmr.msra.gmra.mxu3 %v77_v51 }
  0x2b   :  { %521 = vmatpush.bf16.msrb.mxu0 %v806_v48 }
  0x2c   :  { %534 = vmatpush.bf16.msrb.mxu1 %v814_v49 }
  0x2f   :  { %522 = vmatpush.bf16.msrb.mxu0 %v805_v52 }
  0x30   :  { %535 = vmatpush.bf16.msrb.mxu1 %v813_v53 }
  0x33   :  { %523 = vmatpush.bf16.msrb.mxu0 %v804_v54 }
  0x34   :  { %536 = vmatpush.bf16.msrb.mxu1 %v812_v55 }
  0x37   :  { %524 = vmatpush.bf16.msrb.mxu0 %v803_v56 }
  0x38   :  { %537 = vmatpush.bf16.msrb.mxu1 %v811_v57 }
  0x3b   :  { %525 = vmatpush.bf16.msrb.mxu0 %v802_v58 }
  0x3c   :  { %538 = vmatpush.bf16.msrb.mxu1 %v810_v59 }
  0x3f   :  { %526 = vmatpush.bf16.msrb.mxu0 %v801_v60 }
  0x40   :  { %539 = vmatpush.bf16.msrb.mxu1 %v809_v61 }
  0x43   :  { %527 = vmatpush.bf16.msrb.mxu0 %v800_v62 }
  0x44   :  { %540 = vmatpush.bf16.msrb.mxu1 %v808_v63 }
  0x46   :  { %528 = vmatmul.bf16.vlgmr.msrb.gmra.mxu0 %v78_v2 }
  0x47   :  { %541 = vmatmul.bf16.vlgmr.msrb.gmra.mxu1 %v79_v3 }
  0xa3   :  { %v477_v4 = vpop.f32.mrf.mxu0 }
  0xa4   :  { %v490_v5 = vpop.f32.mrf.mxu1  ;;  %v478_v11 = vadd.f32 %v822_v10, %v477_v4 }
  0xa6   :  { %v491_v14 = vadd.f32 %v490_v5, %v478_v11 }
  0xab   :  { %v479_v6 = vpop.f32.mrf.mxu0  ;;  %v503_v8 = vpop.f32.mrf.mxu2 }
  0xac   :  { %v492_v7 = vpop.f32.mrf.mxu1  ;;  %v516_v9 = vpop.f32.mrf.mxu3  ;;  %v504_v15 = vadd.f32 %v503_v8, %v491_v14 }
  0xae   :  { %v517_v16 = vadd.f32 %v516_v9, %v504_v15 }
  0xb3   :  { %v505_v12 = vpop.f32.mrf.mxu2 }
  0xb4   :  { %v518_v13 = vpop.f32.mrf.mxu3 }
  0xc3   :  { %v529_v17 = vpop.f32.mrf.mxu0 }
  0xc4   :  { %v542_v18 = vpop.f32.mrf.mxu1  ;;  %v530_v19 = vadd.f32 %v529_v17, %v517_v16 }
  0xc6   :  { %v543_v20 = vadd.f32 %v542_v18, %v530_v19 }
  0xc8   :  { %546 = vmax.xlane.f32.xlu0 %v543_v20 }
  0xcb   :  { %v531_v21 = vpop.f32.mrf.mxu0 }
  0xcc   :  { %v544_v22 = vpop.f32.mrf.mxu1 }
 0x13b   :  { %v547_v23 = vpop.xlane.xlu0 %546 }
 0x13c   :  { %v548_v24 = vsub.f32 %v543_v20, %v547_v23 }
 0x13e   :  { %v549_v25 = vmul.f32 1.442695, %v548_v24 }
 0x140   :  { %823 = vpow2.f32 %v549_v25 }
 0x146   :  { %v824_v26 = vpop.eup %823 }
 0x147   :  { %551 = vadd.xlane.f32.xlu0 %v824_v26 }
 0x1ba   :  { %v552_v27 = vpop.xlane.xlu0 %551 }
 0x1bb   :  { %825 = vlog2.f32 %v552_v27 }
 0x1c1   :  { %v826_v28 = vpop.eup %825 }
 0x1c2   :  { %v554_v29 = vmul.f32 0.6931472, %v826_v28 }
 0x1c4   :  { %v555_v30 = vsub.f32 %v548_v24, %v554_v29 }
 0x1c6   :  { %556 = vst [vmem:[#allocation5] sm:$0xff] %v555_v30 }
 0x1c7   :  { %560 = vsyncadd [#allocation4], 96  ;;  %s563_s9 = sshll.u32 %s941_s3, 4  ;;  %s882_s10 = smov [#allocation5]   ;;  %s564_s9 = int_to_ptr.hbm [resolvable:$true] %s563_s9 }
 0x1c8   :  { %s561_s11 = sshll.u32 %s882_s10, 4  ;;  %s883_s12 = smov 32   ;;  %s562_s11 = int_to_ptr.vmem [resolvable:$true] %s561_s11 }
 0x1c9   :  { %s884_s13 = smov 2  }
 0x1ca   :  { %569 = dma.vmem_to_hbm [thread:$0]  %s562_s11, 32, %s564_s9, [#allocation4], %s883_s12, %s883_s12, %s884_s13  }
 0x1cb   :  { %877 = dma.done.wait [#allocation4], 128  }
 0x1cc   :  { %878 = vsyncadd [#allocation4], 4294967168 }
 0x1cd   :  { %574 = vsyncpa [#allocation3], 1 }
 0x1ce   :  { %575 = vsyncpa [#allocation4], 1 }

</bundles_post_ra>
